<compile_context>
chip_gen: v6e
topology: v6e:2x2x1
jax: 0.10.0
libtpu: 0.0.40
codegen_flags: <defaults>
</compile_context>

<pallas_src>
import functools

import jax
import jax.numpy as jnp
from jax import lax
from jax.experimental import pallas as pl
from jax.experimental.pallas import tpu as pltpu


def _spectral_kernel(x_ref, fwd_ref, inv_ref, w_ref, wh_ref, thr_ref, o_ref,
                     *, f_valid, f_pad, bt, c, median_rank, use_adaptive_filter):
    w_lanes = bt * c

    # ---- forward rFFT: one fused (2Fp, N) x (N, W) MXU matmul, f32 accumulation ----
    xspec = jnp.dot(fwd_ref[...], x_ref[...],
                    preferred_element_type=jnp.float32)             # (2Fp, W)
    xre = xspec[:f_pad, :]                                           # (Fp, W) sublane-aligned
    xim = xspec[f_pad:, :]                                           # (Fp, W)

    # ---- adaptive high-frequency mask (per batch; forward value is hard 0/1) ----
    mask_full = jnp.zeros((f_pad, w_lanes), jnp.float32)
    if use_adaptive_filter:
        thr = thr_ref[0, 0]
        sq = xre * xre + xim * xim                                   # |X|^2 per (freq, lane)
        lane_ids = lax.broadcasted_iota(jnp.int32, (1, w_lanes), 1)
        valid_col = lax.broadcasted_iota(jnp.int32, (f_pad, 1), 0) < f_valid
        valid_row = (lax.broadcasted_iota(jnp.int32, (1, f_pad), 1)
                     < f_valid).astype(jnp.float32)
        ones_col = jnp.ones((f_pad, 1), jnp.float32)
        inf = jnp.float32(jnp.inf)
        for b in range(bt):                                          # bt is small & static
            chan = jnp.logical_and(lane_ids >= b * c,
                                   lane_ids < (b + 1) * c).astype(jnp.float32)
            # per-batch, channel-summed energy (one value per frequency bin)
            e_col = jnp.sum(sq * chan, axis=1, keepdims=True)        # (Fp, 1)
            # Lane-broadcast copy of e_col via an exact rank-1 (K=1) matmul:
            # e_row[i, j] = e_col[j] -- avoids an XLU transpose.
            e_row = lax.dot_general(
                ones_col, e_col,
                dimension_numbers=(((1,), (1,)), ((), ())),
                preferred_element_type=jnp.float32)                  # (Fp, Fp)
            leq = (e_row <= e_col).astype(jnp.float32) * valid_row   # [i,j]=(e_j <= e_i)
            cnt = jnp.sum(leq, axis=1, keepdims=True)                # (Fp, 1)
            # torch.median = LOWER median = k-th order statistic, k=(F-1)//2 (0-indexed)
            is_cand = jnp.logical_and(cnt >= jnp.float32(median_rank + 1), valid_col)
            median = jnp.min(jnp.where(is_cand, e_col, inf),
                             axis=0, keepdims=True)                  # (1, 1)
            normalized = e_col / (median + jnp.float32(1e-6))
            mask_b = (normalized > thr).astype(jnp.float32)          # (Fp, 1)
            mask_full = mask_full + mask_b * chan                    # (Fp, W)

    # ---- complex spectral weighting:  Y = X * (w + mask * w_high) ----
    wr, wi = w_ref[0:1, :], w_ref[1:2, :]                            # (1, W)
    whr, whi = wh_ref[0:1, :], wh_ref[1:2, :]                        # (1, W)
    ar = wr + mask_full * whr
    ai = wi + mask_full * whi
    yre = (xre * ar - xim * ai).astype(inv_ref.dtype)                # (Fp, W)
    yim = (xre * ai + xim * ar).astype(inv_ref.dtype)                # (Fp, W)

    # ---- inverse rFFT: two (N, Fp) x (Fp, W) MXU matmuls (no scratch roundtrip) ----
    out = jnp.dot(inv_ref[0], yre, preferred_element_type=jnp.float32)
    out = out + jnp.dot(inv_ref[1], yim, preferred_element_type=jnp.float32)
    o_ref[...] = out.astype(o_ref.dtype)


def _round_up(x, m):
    return ((x + m - 1) // m) * m


def _pick_batch_tile(b, c):
    """Largest-lane-friendly batch tile: bt divides b and bt*c is a multiple of 256
    (preferred) or 128; otherwise the full batch (full-width block is always legal)."""
    for target in (256, 128):
        for bt in range(1, b + 1):
            if b % bt == 0 and (bt * c) % target == 0:
                return bt
    return b


def _build_dft_mats(n, f_pad, dtype):
    """fwd: (2Fp, N) stacked [cos; -sin]; inv: (2, N, Fp) stacked [icos; isin].
    Padded frequency rows/cols are exactly zero. Matches norm='ortho' rfft/irfft."""
    f = n // 2 + 1
    n_idx = jnp.arange(n, dtype=jnp.float32)
    kk = jnp.arange(f_pad, dtype=jnp.float32)
    scale = 1.0 / jnp.sqrt(jnp.float32(n))
    valid = (kk < f).astype(jnp.float32)             # zero padded frequency rows
    ang_f = 2.0 * jnp.pi * kk[:, None] * n_idx[None, :] / n          # (Fp, N)
    fwd = jnp.concatenate([jnp.cos(ang_f) * scale * valid[:, None],
                           -jnp.sin(ang_f) * scale * valid[:, None]], axis=0)
    # Hermitian reconstruction factors: DC and (even-N) Nyquist bins count once;
    # their sin columns are identically zero so their imaginary parts are ignored,
    # exactly like torch.fft.irfft.
    ck = jnp.where(kk == 0, 1.0, 2.0)
    if n % 2 == 0:
        ck = jnp.where(kk == jnp.float32(f - 1), 1.0, ck)
    ang_i = 2.0 * jnp.pi * n_idx[:, None] * kk[None, :] / n          # (N, Fp)
    icos = jnp.cos(ang_i) * (ck * scale * valid)[None, :]
    isin = -jnp.sin(ang_i) * (ck * scale * valid)[None, :]
    inv = jnp.stack([icos, isin], axis=0)                            # (2, N, Fp)
    return fwd.astype(dtype), inv.astype(dtype)


def adaptive_spectral_block(x_in, complex_weight, complex_weight_high,
                            threshold_param, *, use_adaptive_filter=True,
                            dft_dtype=jnp.bfloat16):
    b, n, c = x_in.shape
    f = n // 2 + 1
    f_pad = _round_up(f, 8)
    bt = _pick_batch_tile(b, c)
    w_lanes = bt * c

    fwd, inv = _build_dft_mats(n, f_pad, dft_dtype)

    # (B, N, C) -> (N, B*C): batch folded into the lane (column) dimension.
    xt = jnp.transpose(x_in, (1, 0, 2)).reshape(n, b * c).astype(dft_dtype)

    # view_as_complex(weight): real = [:, 0], imag = [:, 1]; tiled across the bt
    # batches that share one tile (column order is batch-major, channel-minor).
    w_pair = jnp.stack([complex_weight[:, 0], complex_weight[:, 1]], axis=0)
    wh_pair = jnp.stack([complex_weight_high[:, 0], complex_weight_high[:, 1]], axis=0)
    w = jnp.tile(w_pair.astype(jnp.float32), (1, bt))                # (2, W)
    wh = jnp.tile(wh_pair.astype(jnp.float32), (1, bt))              # (2, W)
    thr = jnp.reshape(threshold_param.astype(jnp.float32), (1, 1))

    kernel = functools.partial(
        _spectral_kernel, f_valid=f, f_pad=f_pad, bt=bt, c=c,
        median_rank=(f - 1) // 2, use_adaptive_filter=use_adaptive_filter)

    out_flat = pl.pallas_call(
        kernel,
        out_shape=jax.ShapeDtypeStruct((n, b * c), x_in.dtype),
        grid=(b // bt,),
        in_specs=[
            pl.BlockSpec((n, w_lanes), lambda i: (0, i)),            # x tile (N, W)
            pl.BlockSpec((2 * f_pad, n), lambda i: (0, 0)),          # fused fwd DFT
            pl.BlockSpec((2, n, f_pad), lambda i: (0, 0, 0)),        # [icos; isin]
            pl.BlockSpec((2, w_lanes), lambda i: (0, 0)),            # complex_weight
            pl.BlockSpec((2, w_lanes), lambda i: (0, 0)),            # complex_weight_high
            pl.BlockSpec(memory_space=pltpu.SMEM),                   # threshold scalar
        ],
        out_specs=pl.BlockSpec((n, w_lanes), lambda i: (0, i)),
        compiler_params=pltpu.CompilerParams(
            dimension_semantics=("parallel",),
            vmem_limit_bytes=48 * 1024 * 1024),
    )(xt, fwd, inv, w, wh, thr)

    # (N, B*C) -> (B, N, C)
    return jnp.transpose(out_flat.reshape(n, b, c), (1, 0, 2))


if __name__ == "__main__":
    key = jax.random.PRNGKey(0)
    k_x, k_w, k_wh, k_thr = jax.random.split(key, 4)

    B, N, C = 2, 16, 8  # dim = C
    x = jax.random.normal(k_x, (B, N, C), dtype=jnp.float32)

    # Parameter init matching the module's __init__ shapes
    # (trunc_normal std=0.02 for the complex weights, uniform [0,1) threshold).
    complex_weight = 0.02 * jax.random.truncated_normal(k_w, -2.0, 2.0, (C, 2), jnp.float32)
    complex_weight_high = 0.02 * jax.random.truncated_normal(k_wh, -2.0, 2.0, (C, 2), jnp.float32)
    threshold_param = jax.random.uniform(k_thr, (1,), jnp.float32)

    out = adaptive_spectral_block(x, complex_weight, complex_weight_high, threshold_param)
    out = jax.block_until_ready(out)
    assert out.shape == (B, N, C) and out.dtype == x.dtype
    print("KERNEL_OK")
</pallas_src>

<mosaic_0001>
module attributes {stable_mosaic.version = 11 : i64} {
  func.func @_spectral_kernel(%arg0: i32, %arg1: memref<16x16xbf16, #tpu.memory_space<vmem>>, %arg2: memref<32x16xbf16, #tpu.memory_space<vmem>>, %arg3: memref<2x16x16xbf16, #tpu.memory_space<vmem>>, %arg4: memref<2x16xf32, #tpu.memory_space<vmem>>, %arg5: memref<2x16xf32, #tpu.memory_space<vmem>>, %arg6: memref<1x1xf32, #tpu.memory_space<smem>>, %arg7: memref<16x16xf32, #tpu.memory_space<vmem>>) attributes {dimension_semantics = [#tpu.dimension_semantics<parallel>], iteration_bounds = array<i64: 1>, scalar_prefetch = 0 : i64, scratch_operands = 0 : i64, tpu.core_type = #tpu.core_type<tc>, window_params = [{transform_indices = @transform_0, window_bounds = array<i64: 16, 16>}, {pipeline_mode = #tpu.pipeline_mode<synchronous>, transform_indices = @transform_1, window_bounds = array<i64: 32, 16>}, {pipeline_mode = #tpu.pipeline_mode<synchronous>, transform_indices = @transform_2, window_bounds = array<i64: 2, 16, 16>}, {pipeline_mode = #tpu.pipeline_mode<synchronous>, transform_indices = @transform_3, window_bounds = array<i64: 2, 16>}, {pipeline_mode = #tpu.pipeline_mode<synchronous>, transform_indices = @transform_4, window_bounds = array<i64: 2, 16>}, {transform_indices = @transform_5, window_bounds = array<i64: 1, 1>}, {transform_indices = @transform_6, window_bounds = array<i64: 16, 16>}]} {
    %c0 = arith.constant 0 : index
    %c0_0 = arith.constant 0 : index
    %0 = vector.load %arg2[%c0, %c0_0] : memref<32x16xbf16, #tpu.memory_space<vmem>>, vector<32x16xbf16>
    %c0_1 = arith.constant 0 : index
    %c0_2 = arith.constant 0 : index
    %1 = vector.load %arg1[%c0_1, %c0_2] : memref<16x16xbf16, #tpu.memory_space<vmem>>, vector<16x16xbf16>
    %cst = arith.constant dense<0.000000e+00> : vector<32x16xf32>
    %2 = tpu.matmul %0, %1, %cst {dimension_numbers = #tpu.dot_dimension_numbers<[1], [0], [0], [1], [0, 0, 1, 1], [], []>} : vector<32x16xbf16>, vector<16x16xbf16>, vector<32x16xf32> -> vector<32x16xf32>
    %3 = vector.extract_strided_slice %2 {offsets = [0, 0], sizes = [16, 16], strides = [1, 1]} : vector<32x16xf32> to vector<16x16xf32>
    %4 = vector.extract_strided_slice %2 {offsets = [16, 0], sizes = [16, 16], strides = [1, 1]} : vector<32x16xf32> to vector<16x16xf32>
    %cst_3 = arith.constant 0.000000e+00 : f32
    %5 = vector.broadcast %cst_3 : f32 to vector<16x16xf32>
    %c0_4 = arith.constant 0 : index
    %c0_5 = arith.constant 0 : index
    %6 = memref.load %arg6[%c0_4, %c0_5] : memref<1x1xf32, #tpu.memory_space<smem>>
    %7 = arith.mulf %3, %3 : vector<16x16xf32>
    %8 = arith.mulf %4, %4 : vector<16x16xf32>
    %9 = arith.addf %7, %8 : vector<16x16xf32>
    %10 = tpu.iota {dimensions = array<i32: 1>} : vector<1x16xi32>
    %11 = tpu.iota {dimensions = array<i32: 0>} : vector<16x1xi32>
    %c9_i32 = arith.constant 9 : i32
    %12 = vector.broadcast %c9_i32 : i32 to vector<16x1xi32>
    %13 = arith.cmpi slt, %11, %12 : vector<16x1xi32>
    %14 = tpu.iota {dimensions = array<i32: 1>} : vector<1x16xi32>
    %c9_i32_6 = arith.constant 9 : i32
    %15 = vector.broadcast %c9_i32_6 : i32 to vector<1x16xi32>
    %16 = arith.cmpi slt, %14, %15 : vector<1x16xi32>
    %17 = arith.extui %16 : vector<1x16xi1> to vector<1x16xi32>
    %18 = arith.sitofp %17 : vector<1x16xi32> to vector<1x16xf32>
    %cst_7 = arith.constant 1.000000e+00 : f32
    %19 = vector.broadcast %cst_7 : f32 to vector<16x1xf32>
    %c0_i32 = arith.constant 0 : i32
    %20 = vector.broadcast %c0_i32 : i32 to vector<1x16xi32>
    %21 = arith.cmpi sge, %10, %20 : vector<1x16xi32>
    %c8_i32 = arith.constant 8 : i32
    %22 = vector.broadcast %c8_i32 : i32 to vector<1x16xi32>
    %23 = arith.cmpi slt, %10, %22 : vector<1x16xi32>
    %24 = arith.andi %21, %23 : vector<1x16xi1>
    %25 = arith.extui %24 : vector<1x16xi1> to vector<1x16xi32>
    %26 = arith.sitofp %25 : vector<1x16xi32> to vector<1x16xf32>
    %27 = vector.broadcast %26 : vector<1x16xf32> to vector<16x16xf32>
    %28 = arith.mulf %9, %27 : vector<16x16xf32>
    %cst_8 = arith.constant dense<0.000000e+00> : vector<16xf32>
    %29 = vector.multi_reduction <add>, %28, %cst_8 [1] : vector<16x16xf32> to vector<16xf32>
    %30 = vector.shape_cast %29 : vector<16xf32> to vector<16x1xf32>
    %cst_9 = arith.constant dense<0.000000e+00> : vector<16x16xf32>
    %31 = tpu.matmul %19, %30, %cst_9 {dimension_numbers = #tpu.dot_dimension_numbers<[1], [1], [0], [0], [0, 0, 1, 0], [], []>} : vector<16x1xf32>, vector<16x1xf32>, vector<16x16xf32> -> vector<16x16xf32>
    %32 = vector.broadcast %30 : vector<16x1xf32> to vector<16x16xf32>
    %33 = arith.cmpf ole, %31, %32 : vector<16x16xf32>
    %34 = arith.extui %33 : vector<16x16xi1> to vector<16x16xi32>
    %35 = arith.sitofp %34 : vector<16x16xi32> to vector<16x16xf32>
    %36 = vector.broadcast %18 : vector<1x16xf32> to vector<16x16xf32>
    %37 = arith.mulf %35, %36 : vector<16x16xf32>
    %cst_10 = arith.constant dense<0.000000e+00> : vector<16xf32>
    %38 = vector.multi_reduction <add>, %37, %cst_10 [1] : vector<16x16xf32> to vector<16xf32>
    %39 = vector.shape_cast %38 : vector<16xf32> to vector<16x1xf32>
    %cst_11 = arith.constant 5.000000e+00 : f32
    %40 = vector.broadcast %cst_11 : f32 to vector<16x1xf32>
    %41 = arith.cmpf oge, %39, %40 : vector<16x1xf32>
    %42 = arith.andi %41, %13 : vector<16x1xi1>
    %cst_12 = arith.constant 0x7F800000 : f32
    %43 = vector.broadcast %cst_12 : f32 to vector<16x1xf32>
    %44 = arith.select %42, %30, %43 : vector<16x1xi1>, vector<16x1xf32>
    %cst_13 = arith.constant dense<0x7F800000> : vector<1xf32>
    %45 = vector.multi_reduction <minimumf>, %44, %cst_13 [0] : vector<16x1xf32> to vector<1xf32>
    %46 = vector.shape_cast %45 : vector<1xf32> to vector<1x1xf32>
    %cst_14 = arith.constant 9.99999997E-7 : f32
    %47 = vector.broadcast %cst_14 : f32 to vector<1x1xf32>
    %48 = arith.addf %46, %47 : vector<1x1xf32>
    %49 = vector.broadcast %48 : vector<1x1xf32> to vector<16x1xf32>
    %50 = arith.divf %30, %49 : vector<16x1xf32>
    %51 = vector.broadcast %6 : f32 to vector<16x1xf32>
    %52 = arith.cmpf ogt, %50, %51 : vector<16x1xf32>
    %53 = arith.extui %52 : vector<16x1xi1> to vector<16x1xi32>
    %54 = arith.sitofp %53 : vector<16x1xi32> to vector<16x1xf32>
    %55 = vector.broadcast %54 : vector<16x1xf32> to vector<16x16xf32>
    %56 = vector.broadcast %26 : vector<1x16xf32> to vector<16x16xf32>
    %57 = arith.mulf %55, %56 : vector<16x16xf32>
    %58 = arith.addf %5, %57 : vector<16x16xf32>
    %c8_i32_15 = arith.constant 8 : i32
    %59 = vector.broadcast %c8_i32_15 : i32 to vector<1x16xi32>
    %60 = arith.cmpi sge, %10, %59 : vector<1x16xi32>
    %c16_i32 = arith.constant 16 : i32
    %61 = vector.broadcast %c16_i32 : i32 to vector<1x16xi32>
    %62 = arith.cmpi slt, %10, %61 : vector<1x16xi32>
    %63 = arith.andi %60, %62 : vector<1x16xi1>
    %64 = arith.extui %63 : vector<1x16xi1> to vector<1x16xi32>
    %65 = arith.sitofp %64 : vector<1x16xi32> to vector<1x16xf32>
    %66 = vector.broadcast %65 : vector<1x16xf32> to vector<16x16xf32>
    %67 = arith.mulf %9, %66 : vector<16x16xf32>
    %cst_16 = arith.constant dense<0.000000e+00> : vector<16xf32>
    %68 = vector.multi_reduction <add>, %67, %cst_16 [1] : vector<16x16xf32> to vector<16xf32>
    %69 = vector.shape_cast %68 : vector<16xf32> to vector<16x1xf32>
    %cst_17 = arith.constant dense<0.000000e+00> : vector<16x16xf32>
    %70 = tpu.matmul %19, %69, %cst_17 {dimension_numbers = #tpu.dot_dimension_numbers<[1], [1], [0], [0], [0, 0, 1, 0], [], []>} : vector<16x1xf32>, vector<16x1xf32>, vector<16x16xf32> -> vector<16x16xf32>
    %71 = vector.broadcast %69 : vector<16x1xf32> to vector<16x16xf32>
    %72 = arith.cmpf ole, %70, %71 : vector<16x16xf32>
    %73 = arith.extui %72 : vector<16x16xi1> to vector<16x16xi32>
    %74 = arith.sitofp %73 : vector<16x16xi32> to vector<16x16xf32>
    %75 = vector.broadcast %18 : vector<1x16xf32> to vector<16x16xf32>
    %76 = arith.mulf %74, %75 : vector<16x16xf32>
    %cst_18 = arith.constant dense<0.000000e+00> : vector<16xf32>
    %77 = vector.multi_reduction <add>, %76, %cst_18 [1] : vector<16x16xf32> to vector<16xf32>
    %78 = vector.shape_cast %77 : vector<16xf32> to vector<16x1xf32>
    %cst_19 = arith.constant 5.000000e+00 : f32
    %79 = vector.broadcast %cst_19 : f32 to vector<16x1xf32>
    %80 = arith.cmpf oge, %78, %79 : vector<16x1xf32>
    %81 = arith.andi %80, %13 : vector<16x1xi1>
    %cst_20 = arith.constant 0x7F800000 : f32
    %82 = vector.broadcast %cst_20 : f32 to vector<16x1xf32>
    %83 = arith.select %81, %69, %82 : vector<16x1xi1>, vector<16x1xf32>
    %cst_21 = arith.constant dense<0x7F800000> : vector<1xf32>
    %84 = vector.multi_reduction <minimumf>, %83, %cst_21 [0] : vector<16x1xf32> to vector<1xf32>
    %85 = vector.shape_cast %84 : vector<1xf32> to vector<1x1xf32>
    %cst_22 = arith.constant 9.99999997E-7 : f32
    %86 = vector.broadcast %cst_22 : f32 to vector<1x1xf32>
    %87 = arith.addf %85, %86 : vector<1x1xf32>
    %88 = vector.broadcast %87 : vector<1x1xf32> to vector<16x1xf32>
    %89 = arith.divf %69, %88 : vector<16x1xf32>
    %90 = vector.broadcast %6 : f32 to vector<16x1xf32>
    %91 = arith.cmpf ogt, %89, %90 : vector<16x1xf32>
    %92 = arith.extui %91 : vector<16x1xi1> to vector<16x1xi32>
    %93 = arith.sitofp %92 : vector<16x1xi32> to vector<16x1xf32>
    %94 = vector.broadcast %93 : vector<16x1xf32> to vector<16x16xf32>
    %95 = vector.broadcast %65 : vector<1x16xf32> to vector<16x16xf32>
    %96 = arith.mulf %94, %95 : vector<16x16xf32>
    %97 = arith.addf %58, %96 : vector<16x16xf32>
    %c0_23 = arith.constant 0 : index
    %c0_24 = arith.constant 0 : index
    %98 = vector.load %arg4[%c0_23, %c0_24] : memref<2x16xf32, #tpu.memory_space<vmem>>, vector<1x16xf32>
    %c1 = arith.constant 1 : index
    %c0_25 = arith.constant 0 : index
    %99 = vector.load %arg4[%c1, %c0_25] : memref<2x16xf32, #tpu.memory_space<vmem>>, vector<1x16xf32>
    %c0_26 = arith.constant 0 : index
    %c0_27 = arith.constant 0 : index
    %100 = vector.load %arg5[%c0_26, %c0_27] : memref<2x16xf32, #tpu.memory_space<vmem>>, vector<1x16xf32>
    %c1_28 = arith.constant 1 : index
    %c0_29 = arith.constant 0 : index
    %101 = vector.load %arg5[%c1_28, %c0_29] : memref<2x16xf32, #tpu.memory_space<vmem>>, vector<1x16xf32>
    %102 = vector.broadcast %100 : vector<1x16xf32> to vector<16x16xf32>
    %103 = arith.mulf %97, %102 : vector<16x16xf32>
    %104 = vector.broadcast %98 : vector<1x16xf32> to vector<16x16xf32>
    %105 = arith.addf %104, %103 : vector<16x16xf32>
    %106 = vector.broadcast %101 : vector<1x16xf32> to vector<16x16xf32>
    %107 = arith.mulf %97, %106 : vector<16x16xf32>
    %108 = vector.broadcast %99 : vector<1x16xf32> to vector<16x16xf32>
    %109 = arith.addf %108, %107 : vector<16x16xf32>
    %110 = arith.mulf %3, %105 : vector<16x16xf32>
    %111 = arith.mulf %4, %109 : vector<16x16xf32>
    %112 = arith.subf %110, %111 : vector<16x16xf32>
    %113 = arith.truncf %112 : vector<16x16xf32> to vector<16x16xbf16>
    %114 = arith.mulf %3, %109 : vector<16x16xf32>
    %115 = arith.mulf %4, %105 : vector<16x16xf32>
    %116 = arith.addf %114, %115 : vector<16x16xf32>
    %117 = arith.truncf %116 : vector<16x16xf32> to vector<16x16xbf16>
    %c0_30 = arith.constant 0 : index
    %c0_31 = arith.constant 0 : index
    %c0_32 = arith.constant 0 : index
    %118 = vector.load %arg3[%c0_30, %c0_31, %c0_32] : memref<2x16x16xbf16, #tpu.memory_space<vmem>>, vector<1x16x16xbf16>
    %119 = vector.shape_cast %118 : vector<1x16x16xbf16> to vector<16x16xbf16>
    %cst_33 = arith.constant dense<0.000000e+00> : vector<16x16xf32>
    %120 = tpu.matmul %119, %113, %cst_33 {dimension_numbers = #tpu.dot_dimension_numbers<[1], [0], [0], [1], [0, 0, 1, 1], [], []>} : vector<16x16xbf16>, vector<16x16xbf16>, vector<16x16xf32> -> vector<16x16xf32>
    %c1_34 = arith.constant 1 : index
    %c0_35 = arith.constant 0 : index
    %c0_36 = arith.constant 0 : index
    %121 = vector.load %arg3[%c1_34, %c0_35, %c0_36] : memref<2x16x16xbf16, #tpu.memory_space<vmem>>, vector<1x16x16xbf16>
    %122 = vector.shape_cast %121 : vector<1x16x16xbf16> to vector<16x16xbf16>
    %cst_37 = arith.constant dense<0.000000e+00> : vector<16x16xf32>
    %123 = tpu.matmul %122, %117, %cst_37 {dimension_numbers = #tpu.dot_dimension_numbers<[1], [0], [0], [1], [0, 0, 1, 1], [], []>} : vector<16x16xbf16>, vector<16x16xbf16>, vector<16x16xf32> -> vector<16x16xf32>
    %124 = arith.addf %120, %123 : vector<16x16xf32>
    %c0_38 = arith.constant 0 : index
    %c0_39 = arith.constant 0 : index
    %125 = vector.load %arg7[%c0_38, %c0_39] : memref<16x16xf32, #tpu.memory_space<vmem>>, vector<16x16xf32>
    tpu.vector_store %arg7[%c0_38, %c0_39], %124 {strides = array<i32>} : memref<16x16xf32, #tpu.memory_space<vmem>>, vector<16x16xf32>,
    return
  }
  func.func @transform_0(%arg0: i32) -> (i32, i32) {
    %c0_i32 = arith.constant 0 : i32
    %c0_i32_0 = arith.constant 0 : i32
    return %c0_i32, %arg0 : i32, i32
  }
  func.func @transform_1(%arg0: i32) -> (i32, i32) {
    %c0_i32 = arith.constant 0 : i32
    %c0_i32_0 = arith.constant 0 : i32
    %c0_i32_1 = arith.constant 0 : i32
    return %c0_i32, %c0_i32_0 : i32, i32
  }
  func.func @transform_2(%arg0: i32) -> (i32, i32, i32) {
    %c0_i32 = arith.constant 0 : i32
    %c0_i32_0 = arith.constant 0 : i32
    %c0_i32_1 = arith.constant 0 : i32
    %c0_i32_2 = arith.constant 0 : i32
    return %c0_i32, %c0_i32_0, %c0_i32_1 : i32, i32, i32
  }
  func.func @transform_3(%arg0: i32) -> (i32, i32) {
    %c0_i32 = arith.constant 0 : i32
    %c0_i32_0 = arith.constant 0 : i32
    %c0_i32_1 = arith.constant 0 : i32
    return %c0_i32, %c0_i32_0 : i32, i32
  }
  func.func @transform_4(%arg0: i32) -> (i32, i32) {
    %c0_i32 = arith.constant 0 : i32
    %c0_i32_0 = arith.constant 0 : i32
    %c0_i32_1 = arith.constant 0 : i32
    return %c0_i32, %c0_i32_0 : i32, i32
  }
  func.func @transform_5(%arg0: i32) -> (i32, i32) {
    %c0_i32 = arith.constant 0 : i32
    %c0_i32_0 = arith.constant 0 : i32
    %c0_i32_1 = arith.constant 0 : i32
    return %c0_i32, %c0_i32_0 : i32, i32
  }
  func.func @transform_6(%arg0: i32) -> (i32, i32) {
    %c0_i32 = arith.constant 0 : i32
    %c0_i32_0 = arith.constant 0 : i32
    return %c0_i32, %arg0 : i32, i32
  }
}

</mosaic_0001>

<bundles_post_ra>
// kernel: tpu_custom_call.1
= control target key start
LH: loop header
LB: loop body
LE: loop exit
PB: predicated region body
PF: predicated region fallthrough
CT: control target
= control target key end

     0   :  { %vm48_vm0 = vcmask 130048   ;;  %s858_s0 = inlined_call_operand.vmem [shape: bf16[16,16], index: 0, kind: input, shape index: {}]   ;;  %s859_s1 = inlined_call_operand.vmem [shape: bf16[32,16], index: 1, kind: input, shape index: {}]   ;;  %s860_s2 = inlined_call_operand.vmem [shape: bf16[2,16,16], index: 2, kind: input, shape index: {}]   ;;  %s861_s3 = inlined_call_operand.vmem [shape: f32[2,16], index: 3, kind: input, shape index: {}]   ;;  %s862_s4 = inlined_call_operand.vmem [shape: f32[2,16], index: 4, kind: input, shape index: {}]   ;;  %s863_s5 = inlined_call_operand.<no memory space> [shape: f32[1,1], index: 5, kind: input, shape index: {}]   ;;  %s864_s6 = inlined_call_operand.hbm [shape: f32[16,16], index: 6, kind: output, shape index: {}]  }
   0x1   :  { %v646_v0 = vld [vmem:[%s858_s0] sm:$0xff]   ;;  %v648_v2 = vld [vmem:[%s859_s1 + $0x8] sm:$0xff]  }
   0x2   :  { %v647_v1 = vld [vmem:[%s859_s1] sm:$0xff]   ;;  %608 = vmatprep.subr.bf16.mxu0 %v646_v0 }
   0x3   :  { %609 = vmatpush3.bf16.msra.mxu0 %v646_v0  ;;  %610 = vmatprep.mubr.msk.bf16.mxu0 %vm48_vm0, %v647_v1 }
   0x4   :  { %12 = vsyncpa [#allocation4], 0  ;;  %v111_v3 = vlaneseq  ;;  %v677_v10 = vmov 0.0   ;;  %vm134_vm5 = vcmask 7168   ;;  %v678_v26 = vmov 1.0   ;;  %s680_s12 = smov [#allocation3]  }
   0x5   :  { %618 = vmatprep.mubr.msk.f32.mxu1 %vm134_vm5, %v678_v26  ;;  %vm679_vm11 = vmmov 0   ;;  %s548_s13 = sshll.u32 %s680_s12, 4  ;;  %s549_s13 = int_to_ptr.vmem [resolvable:$true] %s548_s13 }
   0x6   :  { %611 = vmatmul.mubr.msk.bf16.vlgmr.msra.gmra.mxu0 %vm48_vm0, %v648_v2  ;;  %v112_v4 = vand.u32 127, %v111_v3  ;;  %v114_v48 = vshrl.u32 %v111_v3, 7  ;;  %p660_p1 = scmp.lt.s32.totalorder %s549_s13, %s549_s13 }
   0x7   :  { %625 = vmatprep.mubr.msk.f32.mxu0 %vm134_vm5, %v678_v26 }
   0x8   :  { %vm261_vm1 = vcmp.ge.s32.totalorder %v112_v4, 8  ;;  %vm262_vm2 = vcmp.lt.s32.totalorder %v112_v4, 16  ;;  %vm122_vm3 = vcmp.lt.s32.totalorder %v112_v4, 8  ;;  %vm118_vm6 = vcmp.lt.s32.totalorder %v112_v4, 9 }
   0x9   :  { %vm263_vm4 = vmand %vm261_vm1, %vm262_vm2  ;;  %v741_v11 = vsel %vm122_vm3, 1.0, %v677_v10  ;;  %v564_v32 = vsel %vm118_vm6, 1.0, %v677_v10  ;;  %v115_v49 = vadd.s32 8, %v114_v48 }
   0xa   :  { %v746_v14 = vsel %vm263_vm4, 1.0, %v677_v10 }
   0xb   :  { %vm117_vm12 = vcmp.lt.s32.totalorder %v115_v49, 9 }
  0xc6   :  { %v730_v5 = vpop.f32.mrf.mxu0 }
  0xc7   :  { %v107_v7 = vmul.f32 %v730_v5, %v730_v5 }
  0xc8   :  { %v732_v6 = vpop.f32.mrf.mxu0 }
  0xc9   :  { %v105_v8 = vmul.f32 %v732_v6, %v732_v6 }
  0xca   :  { %v738_v9 = vpop.f32.mrf.mxu0 }
  0xcb   :  { %v109_v12 = vadd.f32 %v107_v7, %v105_v8  ;;  %v108_v15 = vmul.f32 %v738_v9, %v738_v9 }
  0xcc   :  { %v743_v13 = vpop.f32.mrf.mxu0 }
  0xcd   :  { %v106_v16 = vmul.f32 %v743_v13, %v743_v13  ;;  %v126_v17 = vmul.f32 %v741_v11, %v109_v12  ;;  %v266_v19 = vmul.f32 %v746_v14, %v109_v12 }
  0xcf   :  { %v128_v18 = vsel %vm48_vm0, %v126_v17, 0.0  ;;  %v110_v20 = vadd.f32 %v108_v15, %v106_v16  ;;  %v268_v22 = vsel %vm48_vm0, %v266_v19, 0.0 }
  0xd0   :  { %129 = vadd.xlane.f32.xlu1 %v128_v18  ;;  %v250_v18 = vstv %s863_s5 }
  0xd1   :  { %v127_v21 = vmul.f32 %v741_v11, %v110_v20  ;;  %v267_v24 = vmul.f32 %v746_v14, %v110_v20 }
  0xd3   :  { %v131_v23 = vsel %vm48_vm0, %v127_v21, 0.0  ;;  %v271_v25 = vsel %vm48_vm0, %v267_v24, 0.0 }
  0xd4   :  { %269 = vadd.xlane.f32.xlu1 %v268_v22  ;;  %132 = vadd.xlane.f32.xlu0 %v131_v23 }
  0xd8   :  { %272 = vadd.xlane.f32.xlu0 %v271_v25 }
 0x159   :  { %v762_v27 = vpop.xlane.xlu1 %129 }
 0x15d   :  { %v764_v28 = vpop.xlane.xlu0 %132  ;;  %v776_v30 = vpop.xlane.xlu1 %269 }
 0x15e   :  { %614 = vmatprep.subr.msk.mxu1 %vm134_vm5, %v764_v28 }
 0x15f   :  { %615 = vmatpush3.xpose.msk.msra.mxu1 %vm134_vm5, %v764_v28 }
 0x160   :  { %616 = vmatprep.subr.msk.mxu1 %vm134_vm5, %v762_v27 }
 0x161   :  { %v772_v29 = vpop.xlane.xlu0 %272 }
 0x162   :  { %621 = vmatprep.subr.msk.mxu0 %vm134_vm5, %v772_v29 }
 0x163   :  { %617 = vmatpush3.xpose.msk.msra.mxu1 %vm134_vm5, %v762_v27  ;;  %622 = vmatpush3.xpose.msk.msra.mxu0 %vm134_vm5, %v772_v29 }
 0x164   :  { %623 = vmatprep.subr.msk.mxu0 %vm134_vm5, %v776_v30  ;;  %628 = vmatprep.subr.bf16.mxu1 %v677_v10 }
 0x166   :  { %619 = vmatmul.mubr.msk.f32.vlgmr.msra.gmra.mxu1 %vm134_vm5, %v678_v26 }
 0x167   :  { %624 = vmatpush3.xpose.msk.msra.mxu0 %vm134_vm5, %v776_v30  ;;  %630 = vmatprep.mubr.msk.bf16.mxu1 %vm679_vm11, %v677_v10 }
 0x168   :  { %634 = vmatprep.subr.bf16.mxu0 %v677_v10 }
 0x16a   :  { %626 = vmatmul.mubr.msk.f32.vlgmr.msra.gmra.mxu0 %vm134_vm5, %v678_v26 }
 0x16b   :  { %636 = vmatprep.mubr.msk.bf16.mxu0 %vm679_vm11, %v677_v10 }
 0x226   :  { %v620_v31 = vpop.f32.mrf.mxu1 }
 0x227   :  { %vm220_vm7 = vcmp.le.f32.partialorder %v620_v31, %v764_v28 }
 0x228   :  { %v571_v33 = vsel %vm220_vm7, 1.0, %v677_v10  ;;  %v210_v34 = vpop.f32.mrf.mxu1 }
 0x229   :  { %vm219_vm8 = vcmp.le.f32.partialorder %v210_v34, %v762_v27  ;;  %v226_v35 = vmul.f32 %v571_v33, %v564_v32  ;;  %v585_v33 = vld [vmem:[%s862_s4 + $0x1] ss:$0 sm:$0xff] }
 0x22a   :  { %v570_v36 = vsel %vm219_vm8, 1.0, %v677_v10  ;;  %v627_v37 = vpop.f32.mrf.mxu0 }
 0x22b   :  { %vm356_vm9 = vcmp.le.f32.partialorder %v627_v37, %v772_v29  ;;  %v230_v38 = vsel %vm48_vm0, %v226_v35, 0.0  ;;  %v225_v39 = vmul.f32 %v570_v36, %v564_v32 }
 0x22c   :  { %v580_v40 = vsel %vm356_vm9, 1.0, %v677_v10  ;;  %231 = vadd.xlane.f32.xlu0 %v230_v38  ;;  %v346_v41 = vpop.f32.mrf.mxu0 }
 0x22d   :  { %vm355_vm10 = vcmp.le.f32.partialorder %v346_v41, %v776_v30  ;;  %v362_v42 = vmul.f32 %v580_v40, %v564_v32  ;;  %v227_v44 = vsel %vm48_vm0, %v225_v39, 0.0 }
 0x22e   :  { %v579_v43 = vsel %vm355_vm10, 1.0, %v677_v10 }
 0x22f   :  { %v366_v45 = vsel %vm48_vm0, %v362_v42, 0.0  ;;  %v361_v46 = vmul.f32 %v579_v43, %v564_v32 }
 0x230   :  { %228 = vadd.xlane.f32.xlu0 %v227_v44  ;;  %367 = vadd.xlane.f32.xlu1 %v366_v45 }
 0x231   :  { %v363_v47 = vsel %vm48_vm0, %v361_v46, 0.0 }
 0x234   :  { %364 = vadd.xlane.f32.xlu1 %v363_v47 }
 0x2b5   :  { %v232_v50 = vpop.xlane.xlu0 %231 }
 0x2b6   :  { %vm234_vm13 = vcmp.ge.f32.partialorder %v232_v50, 5.0 }
 0x2b7   :  { %vm236_vm14 = vmand %vm234_vm13, %vm117_vm12 }
 0x2b8   :  { %v238_v53 = vsel %vm236_vm14, %v764_v28, inf }
 0x2b9   :  { %v368_v51 = vpop.xlane.xlu1 %367  ;;  %v229_v52 = vpop.xlane.xlu0 %228 }
 0x2ba   :  { %vm370_vm15 = vcmp.ge.f32.partialorder %v368_v51, 5.0  ;;  %vm233_vm1 = vcmp.ge.f32.partialorder %v229_v52, 5.0 }
 0x2bb   :  { %v237_v54 = vsel %vm233_vm1, %v762_v27, inf  ;;  %vm372_vm2 = vmand %vm370_vm15, %vm117_vm12 }
 0x2bc   :  { %v239_v55 = vmin.f32 %v237_v54, %v238_v53  ;;  %v374_v58 = vsel %vm372_vm2, %v772_v29, inf }
 0x2bd   :  { %v365_v56 = vpop.xlane.xlu1 %364 }
 0x2be   :  { %v240_v57 = vrot.slane %v239_v55, 4  ;;  %vm369_vm3 = vcmp.ge.f32.partialorder %v365_v56, 5.0 }
 0x2bf   :  { %v373_v59 = vsel %vm369_vm3, %v776_v30, inf }
 0x2c0   :  { %v241_v60 = vmin.f32 %v239_v55, %v240_v57  ;;  %v375_v61 = vmin.f32 %v373_v59, %v374_v58  ;;  %v649_v57 = vld [vmem:[%s860_s2 + $0x8] sm:$0xff]  }
 0x2c2   :  { %v242_v62 = vrot.slane %v241_v60, 2  ;;  %v376_v63 = vrot.slane %v375_v61, 4 }
 0x2c4   :  { %v243_v0 = vmin.f32 %v241_v60, %v242_v62  ;;  %v377_v1 = vmin.f32 %v375_v61, %v376_v63 }
 0x2c6   :  { %v244_v2 = vrot.slane %v243_v0, 1  ;;  %v378_v3 = vrot.slane %v377_v1, 2 }
 0x2c8   :  { %v245_v4 = vmin.f32 %v243_v0, %v244_v2  ;;  %v379_v7 = vmin.f32 %v377_v1, %v378_v3 }
 0x2ca   :  { %v246_v8 = vadd.f32 1e-06, %v245_v4  ;;  %v380_v12 = vrot.slane %v379_v7, 1 }
 0x2cc   :  { %651 = vrcp.f32 %v246_v8  ;;  %v381_v15 = vmin.f32 %v379_v7, %v380_v12 }
 0x2ce   :  { %v382_v16 = vadd.f32 1e-06, %v381_v15 }
 0x2d0   :  { %653 = vrcp.f32 %v382_v16 }
 0x2d9   :  { %v652_v17 = vpop.eup %651 }
 0x2da   :  { %v248_v19 = vmul.f32 %v652_v17, %v762_v27  ;;  %v249_v20 = vmul.f32 %v652_v17, %v764_v28 }
 0x2dc   :  { %vm251_vm4 = vcmp.gt.f32.partialorder %v248_v19, %v250_v18  ;;  %vm252_vm5 = vcmp.gt.f32.partialorder %v249_v20, %v250_v18 }
 0x2dd   :  { %v654_v21 = vpop.eup %653  ;;  %v572_v24 = vsel %vm251_vm4, 1.0, %v677_v10  ;;  %v573_v25 = vsel %vm252_vm5, 1.0, %v677_v10 }
 0x2de   :  { %v384_v22 = vmul.f32 %v654_v21, %v776_v30  ;;  %v385_v23 = vmul.f32 %v654_v21, %v772_v29  ;;  %v257_v27 = vmul.f32 %v572_v24, %v741_v11  ;;  %v258_v28 = vmul.f32 %v573_v25, %v741_v11  ;;  %v583_v29 = vld [vmem:[%s862_s4] ss:$0 sm:$0xff]  ;;  %v586_v11 = vld [vmem:[%s861_s3 + $0x1] ss:$0 sm:$0xff] }
 0x2e0   :  { %vm386_vm6 = vcmp.gt.f32.partialorder %v384_v22, %v250_v18  ;;  %vm387_vm7 = vcmp.gt.f32.partialorder %v385_v23, %v250_v18 }
 0x2e1   :  { %v581_v26 = vsel %vm386_vm6, 1.0, %v677_v10  ;;  %v582_v31 = vsel %vm387_vm7, 1.0, %v677_v10  ;;  %v584_v10 = vld [vmem:[%s861_s3] ss:$0 sm:$0xff] }
 0x2e2   :  { %v392_v32 = vmul.f32 %v581_v26, %v746_v14  ;;  %v393_v30 = vmul.f32 %v582_v31, %v746_v14 }
 0x2e4   :  { %v394_v34 = vadd.f32 %v392_v32, %v257_v27  ;;  %v395_v35 = vadd.f32 %v393_v30, %v258_v28 }
 0x2e6   :  { %v404_v36 = vmul.f32 %v583_v29, %v394_v34  ;;  %v405_v14 = vmul.f32 %v583_v29, %v395_v35  ;;  %v416_v37 = vmul.f32 %v585_v33, %v394_v34  ;;  %v417_v38 = vmul.f32 %v585_v33, %v395_v35 }
 0x2e8   :  { %v410_v39 = vadd.f32 %v584_v10, %v404_v36  ;;  %v411_v40 = vadd.f32 %v584_v10, %v405_v14  ;;  %v422_v41 = vadd.f32 %v586_v11, %v416_v37  ;;  %v423_v42 = vadd.f32 %v586_v11, %v417_v38 }
 0x2ea   :  { %v431_v43 = vmul.f32 %v422_v41, %v732_v6  ;;  %v432_v44 = vmul.f32 %v423_v42, %v743_v13  ;;  %v433_v45 = vmul.f32 %v730_v5, %v410_v39  ;;  %v434_v46 = vmul.f32 %v738_v9, %v411_v40 }
 0x2eb   :  { %v424_v47 = vmul.f32 %v410_v39, %v732_v6  ;;  %v425_v48 = vmul.f32 %v411_v40, %v743_v13  ;;  %v426_v49 = vmul.f32 %v730_v5, %v422_v41  ;;  %v427_v50 = vmul.f32 %v738_v9, %v423_v42  ;;  %v650_v6 = vld [vmem:[%s860_s2] sm:$0xff]   ;;  %s655_s2 = scalar_lea.vmem %s549_s13, 256 }
 0x2ec   :  { %v435_v51 = vadd.f32 %v433_v45, %v431_v43  ;;  %v436_v52 = vadd.f32 %v434_v46, %v432_v44  ;;  %p656_p0 = scmp.ne.s32.totalorder %s549_s13, %s655_s2  ;;  %p661_p2 = scmp.lt.s32.totalorder %s655_s2, %s655_s2 }
 0x2ed   :  { %v428_v53 = vsub.f32 %v424_v47, %v426_v49  ;;  %v429_v54 = vsub.f32 %v425_v48, %v427_v50 }
 0x2ee   :  { %v437_v55 = vpack.c.bf16 %v436_v52, %v435_v51  ;;  %p662_p3 = por %p661_p2, %p660_p1 }
 0x2ef   :  { %v430_v56 = vpack.c.bf16 %v429_v54, %v428_v53 }
 0x2f0   :  { %629 = vmatpush3.bf16.msra.mxu1 %v437_v55  ;;  %p663_p4 = pnand %p662_p3, %p656_p0 }
 0x2f1   :  { %635 = vmatpush3.bf16.msra.mxu0 %v430_v56 }
 0x2f3   :  { %631 = vmatmul.mubr.msk.bf16.vlgmr.msra.gmra.mxu1 %vm48_vm0, %v649_v57 }
 0x2f4   :  { %637 = vmatmul.mubr.msk.bf16.vlgmr.msra.gmra.mxu0 %vm48_vm0, %v650_v6 }
 0x3b3   :  { %v485_v5 = vpop.f32.mrf.mxu1 }
 0x3b4   :  { %v534_v9 = vpop.f32.mrf.mxu0 }
 0x3b5   :  { %v535_v13 = vadd.f32 %v534_v9, %v485_v5  ;;  %v632_v58 = vpop.f32.mrf.mxu1 }
 0x3b6   :  { %v638_v59 = vpop.f32.mrf.mxu0 }
 0x3b7   :  { %541 = vst.msk [vmem:[#allocation3] sm:$0xff] %vm48_vm0, %v535_v13  ;;  %v488_v60 = vpop.f32.mrf.mxu1 }
 0x3b8   :  { %v537_v61 = vpop.f32.mrf.mxu0 }
 0x3b9   :  { %v538_v62 = vadd.f32 %v537_v61, %v488_v60  ;;  %v633_v63 = vpop.f32.mrf.mxu1 }
 0x3ba   :  { %v639_v0 = vpop.f32.mrf.mxu0 }
 0x3bb   :  { %542 = vst.msk [vmem:[#allocation3 + $0x8] sm:$0xff] %vm48_vm0, %v538_v62 }
 0x3bc   :  { %666 = shalt.err (!%p663_p4)
}
 0x3bd   :  { %s681_s14 = smov 128   ;;  %s682_s15 = smov 8  }
 0x3be   :  { %554 = dma.vmem_to_hbm [thread:$0]  %s549_s13, 256, %s864_s6, [#allocation4], %s681_s14, %s681_s14, %s682_s15  }
 0x3bf   :  { %675 = dma.done.wait [#allocation4], 256  }
 0x3c0   :  { %676 = vsyncadd [#allocation4], 4294967040 }
 0x3c1   :  { %558 = vsyncpa [#allocation4], 1 }

</bundles_post_ra>
